<compile_context>
chip_gen: v6e
topology: v6e:2x2x1
jax: 0.10.0
libtpu: 0.0.40
codegen_flags: <defaults>
</compile_context>

<pallas_src>
import jax
import jax.numpy as jnp
from jax.experimental import pallas as pl
from jax.experimental.pallas import tpu as pltpu


def _hardswish(x):
    # torch.nn.Hardswish: x * relu6(x + 3) / 6
    return x * jnp.clip(x + 3.0, 0.0, 6.0) * (1.0 / 6.0)


def _round_up(x, m):
    return ((x + m - 1) // m) * m


def _preference_kernel(x_ref, xp_ref,
                       w1_ref, b1_ref, w2_ref, b2_ref,
                       w3_ref, b3_ref, w3m_ref, b3m_ref,
                       out_ref):
    # x_ref / xp_ref: (tb, in_dim) bf16.  Two independent MLP chains (no
    # concatenate copy); weights are VMEM-resident across the grid.
    def layer(h, w_ref, b_ref, act):
        # Operands in the weight's dtype (bf16 MXU path for the MLP, f32 for the
        # folded layer 3); f32 accumulation + f32 elementwise (v5e-safe).
        y = jnp.dot(h.astype(w_ref.dtype), w_ref[...],
                    preferred_element_type=jnp.float32) + b_ref[...]
        return _hardswish(y) if act else y

    def trunk(v):                                   # shared layers 1-2
        h = layer(v, w1_ref, b1_ref, act=True)
        return layer(h, w2_ref, b2_ref, act=True)   # (tb, h2) f32

    h2_x = trunk(x_ref[...])
    h2_xp = trunk(xp_ref[...])

    # x branch: layer 3 with M = U^T J U folded in (f32, cancellation-sensitive):
    #   g = ex @ M = h2_x @ (W3 @ M) + b3 @ M
    g = layer(h2_x, w3m_ref, b3m_ref, act=False)    # (tb, n) f32
    # x' branch: plain layer 3.
    exp_ = layer(h2_xp, w3_ref, b3_ref, act=False)  # (tb, n) f32

    # w_i = ex_i^T M ex'_i ; store lane-dense as one (1, tb) row.
    out_ref[...] = jnp.sum(g * exp_, axis=1)[None, :]


def preference_embedding_forward(x, x_prime, params, *, block_b=2048):
    """Fused forward pass. Returns w of shape (B,)."""
    w1, b1, w2, b2, w3, b3, u = params
    B, in_dim = x.shape
    n = u.shape[0]
    h1, h2 = w1.shape[1], w2.shape[1]

    # --- Fold J into U, then fold M = U^T J U into the x-branch's third Linear.
    j_blk = jnp.array([[0.0, -1.0], [1.0, 0.0]], dtype=jnp.float32)
    J = jnp.kron(jnp.eye(n // 2, dtype=jnp.float32), j_blk)
    M = u.T @ J @ u                                   # (n, n) f32, skew-symmetric
    w3m = (w3 @ M).astype(jnp.float32)                # kept f32 (accuracy of bilinear form)
    b3m = (b3 @ M).astype(jnp.float32)

    # --- bf16 MXU operands for the MLP; biases stay f32.
    w1b, w2b, w3b = (a.astype(jnp.bfloat16) for a in (w1, w2, w3))

    # --- Batch tiling: big row tiles to amortize grid overhead / MXU push-drain
    # (K=16, N<=128 matmul shapes are inherent to the model, rows are the only
    # utilization lever).  Force >= 2 tiles for larger batches so the
    # "parallel" grid axis can shard over v7x's two TensorCores.
    num_tiles = pl.cdiv(B, block_b)
    if B >= 512:
        num_tiles = max(num_tiles, 2)
    tb = pl.cdiv(B, num_tiles)
    tb = _round_up(tb, 128) if num_tiles > 1 else _round_up(tb, 8)
    grid = pl.cdiv(B, tb)
    b_pad = grid * tb

    # --- bf16 inputs; pad only the batch tail explicitly (OOB reads of a last
    # partial block are unspecified, so we never rely on them).
    xb = x.astype(jnp.bfloat16)
    xpb = x_prime.astype(jnp.bfloat16)
    if b_pad != B:
        pad = ((0, b_pad - B), (0, 0))
        xb = jnp.pad(xb, pad)
        xpb = jnp.pad(xpb, pad)

    flops = b_pad * (4 * (in_dim * h1 + h1 * h2 + h2 * n) + 2 * n)
    bytes_accessed = (2 * b_pad * in_dim * 2 + b_pad * 4
                      + (w1b.size + w2b.size + w3b.size) * 2
                      + (w3m.size + b3m.size + b1.size + b2.size + b3.size) * 4)

    # NOTE: total double-buffered VMEM at tb=2048 is only a few MiB, well under
    # the 32 MiB scoped default on every generation (incl. v7x), so no
    # vmem_limit_bytes override is needed.  pl.Buffered(1) on the constant
    # weight/bias operands would only shave a few KiB; omitted for simplicity.
    out = pl.pallas_call(
        _preference_kernel,
        out_shape=jax.ShapeDtypeStruct((1, b_pad), jnp.float32),
        grid_spec=pltpu.PrefetchScalarGridSpec(
            num_scalar_prefetch=0,
            grid=(grid,),
            in_specs=[
                pl.BlockSpec((tb, in_dim), lambda i: (i, 0)),   # x tile  (bf16)
                pl.BlockSpec((tb, in_dim), lambda i: (i, 0)),   # x' tile (bf16)
                pl.BlockSpec(w1b.shape, lambda i: (0, 0)),
                pl.BlockSpec(b1.shape, lambda i: (0, 0)),
                pl.BlockSpec(w2b.shape, lambda i: (0, 0)),
                pl.BlockSpec(b2.shape, lambda i: (0, 0)),
                pl.BlockSpec(w3b.shape, lambda i: (0, 0)),
                pl.BlockSpec(b3.shape, lambda i: (0, 0)),
                pl.BlockSpec(w3m.shape, lambda i: (0, 0)),
                pl.BlockSpec(b3m.shape, lambda i: (0, 0)),
            ],
            out_specs=pl.BlockSpec((1, tb), lambda i: (0, i)),  # lane-dense scores
        ),
        compiler_params=pltpu.CompilerParams(
            dimension_semantics=("parallel",)),
        cost_estimate=pl.CostEstimate(
            flops=flops, transcendentals=0, bytes_accessed=bytes_accessed),
    )(xb, xpb, w1b, b1, w2b, b2, w3b, b3, w3m, b3m)

    return out[0, :B]


def init_params(key, in_dim, factor=2, sizes=None):
    """Deterministic synthetic parameters matching PreferenceEmbedding.__init__ shapes."""
    if sizes is None:
        sizes = [128, 64]
    assert factor % 2 == 0
    n = in_dim * factor

    dims = [in_dim] + sizes + [n]
    keys = jax.random.split(key, 2 * (len(dims) - 1) + 1)
    params = []
    for i in range(len(dims) - 1):
        fan_in, fan_out = dims[i], dims[i + 1]
        scale = 1.0 / jnp.sqrt(jnp.float32(fan_in))
        w = jax.random.uniform(keys[2 * i], (fan_in, fan_out),
                               minval=-scale, maxval=scale, dtype=jnp.float32)
        b = jax.random.uniform(keys[2 * i + 1], (1, fan_out),
                               minval=-scale, maxval=scale, dtype=jnp.float32)
        params += [w, b]

    # parametrizations.orthogonal(self, 'U'): forward sees an orthogonal n x n matrix.
    # TODO(synk): the orthogonal parametrization itself (QR of the raw weight) is done
    # host-side here; only the resulting orthogonal U participates in the kernel.
    a = jax.random.normal(keys[-1], (n, n), dtype=jnp.float32)
    u, _ = jnp.linalg.qr(a)
    params.append(u.astype(jnp.float32))
    return tuple(params), n


def reference_forward_f32(x, x_prime, params):
    """Pure-JAX f32 reference mirroring the PyTorch module exactly."""
    w1, b1, w2, b2, w3, b3, u = params

    def mlp(v):
        h = _hardswish(v @ w1 + b1)
        h = _hardswish(h @ w2 + b2)
        return h @ w3 + b3

    def left_mult_by_J(v):
        B, n = v.shape
        V = v.reshape(B, n // 2, 2)
        V_rot = jnp.stack((-V[..., 1], V[..., 0]), axis=-1)
        return V_rot.reshape(B, n)

    ex = mlp(x)
    exp_ = mlp(x_prime)
    ux = ex @ u.T
    uxp = exp_ @ u.T
    return jnp.sum(ux * left_mult_by_J(uxp), axis=1)


def reference_forward_kernel_numerics(x, x_prime, params):
    """Pure-JAX reference mirroring the kernel's numerics (bf16 MLP matmuls, f32 folded W3@M)."""
    w1, b1, w2, b2, w3, b3, u = params
    n = u.shape[0]
    j_blk = jnp.array([[0.0, -1.0], [1.0, 0.0]], dtype=jnp.float32)
    J = jnp.kron(jnp.eye(n // 2, dtype=jnp.float32), j_blk)
    M = u.T @ J @ u
    w3m = w3 @ M
    b3m = b3 @ M
    bf = jnp.bfloat16

    def trunk(v):
        h = jnp.dot(v.astype(bf), w1.astype(bf), preferred_element_type=jnp.float32) + b1
        h = _hardswish(h)
        h = jnp.dot(h.astype(bf), w2.astype(bf), preferred_element_type=jnp.float32) + b2
        return _hardswish(h)

    g = jnp.dot(trunk(x), w3m, preferred_element_type=jnp.float32) + b3m
    exp_ = jnp.dot(trunk(x_prime).astype(bf), w3.astype(bf),
                   preferred_element_type=jnp.float32) + b3
    return jnp.sum(g * exp_, axis=1)


if __name__ == "__main__":
    key = jax.random.PRNGKey(0)
    k_params, k_x, k_xp = jax.random.split(key, 3)

    B = 8
    in_dim = 16
    factor = 2

    params, n = init_params(k_params, in_dim, factor=factor)

    x = jax.random.normal(k_x, (B, in_dim), dtype=jnp.float32)
    x_prime = jax.random.normal(k_xp, (B, in_dim), dtype=jnp.float32)

    w = preference_embedding_forward(x, x_prime, params)
    w = jax.block_until_ready(w)
    assert w.shape == (B,)

    # Structural correctness: match a reference using the same folding / dtypes.
    w_ref_mirror = reference_forward_kernel_numerics(x, x_prime, params)
    assert jnp.allclose(w, w_ref_mirror, atol=1e-2, rtol=1e-2), (w, w_ref_mirror)

    # Precision sanity vs the exact f32 module (bf16 MLP operands => small relative error).
    w_ref_f32 = reference_forward_f32(x, x_prime, params)
    rel_err = jnp.linalg.norm(w - w_ref_f32) / (jnp.linalg.norm(w_ref_f32) + 1e-6)
    assert rel_err < 0.1, (rel_err, w, w_ref_f32)

    print("KERNEL_OK")
</pallas_src>

<mosaic_0001>
module attributes {stable_mosaic.version = 11 : i64} {
  func.func @_preference_kernel(%arg0: i32, %arg1: memref<8x16xbf16, #tpu.memory_space<vmem>>, %arg2: memref<8x16xbf16, #tpu.memory_space<vmem>>, %arg3: memref<16x128xbf16, #tpu.memory_space<vmem>>, %arg4: memref<1x128xf32, #tpu.memory_space<vmem>>, %arg5: memref<128x64xbf16, #tpu.memory_space<vmem>>, %arg6: memref<1x64xf32, #tpu.memory_space<vmem>>, %arg7: memref<64x32xbf16, #tpu.memory_space<vmem>>, %arg8: memref<1x32xf32, #tpu.memory_space<vmem>>, %arg9: memref<64x32xf32, #tpu.memory_space<vmem>>, %arg10: memref<1x32xf32, #tpu.memory_space<vmem>>, %arg11: memref<1x8xf32, #tpu.memory_space<vmem>>) attributes {dimension_semantics = [#tpu.dimension_semantics<parallel>], iteration_bounds = array<i64: 1>, scalar_prefetch = 0 : i64, scratch_operands = 0 : i64, tpu.core_type = #tpu.core_type<tc>, window_params = [{transform_indices = @transform_0, window_bounds = array<i64: 8, 16>}, {transform_indices = @transform_1, window_bounds = array<i64: 8, 16>}, {pipeline_mode = #tpu.pipeline_mode<synchronous>, transform_indices = @transform_2, window_bounds = array<i64: 16, 128>}, {pipeline_mode = #tpu.pipeline_mode<synchronous>, transform_indices = @transform_3, window_bounds = array<i64: 1, 128>}, {pipeline_mode = #tpu.pipeline_mode<synchronous>, transform_indices = @transform_4, window_bounds = array<i64: 128, 64>}, {pipeline_mode = #tpu.pipeline_mode<synchronous>, transform_indices = @transform_5, window_bounds = array<i64: 1, 64>}, {pipeline_mode = #tpu.pipeline_mode<synchronous>, transform_indices = @transform_6, window_bounds = array<i64: 64, 32>}, {pipeline_mode = #tpu.pipeline_mode<synchronous>, transform_indices = @transform_7, window_bounds = array<i64: 1, 32>}, {pipeline_mode = #tpu.pipeline_mode<synchronous>, transform_indices = @transform_8, window_bounds = array<i64: 64, 32>}, {pipeline_mode = #tpu.pipeline_mode<synchronous>, transform_indices = @transform_9, window_bounds = array<i64: 1, 32>}, {transform_indices = @transform_10, window_bounds = array<i64: 1, 8>}]} {
    %c0 = arith.constant 0 : index
    %c0_0 = arith.constant 0 : index
    %0 = vector.load %arg1[%c0, %c0_0] : memref<8x16xbf16, #tpu.memory_space<vmem>>, vector<8x16xbf16>
    %c0_1 = arith.constant 0 : index
    %c0_2 = arith.constant 0 : index
    %1 = vector.load %arg3[%c0_1, %c0_2] : memref<16x128xbf16, #tpu.memory_space<vmem>>, vector<16x128xbf16>
    %cst = arith.constant dense<0.000000e+00> : vector<8x128xf32>
    %2 = tpu.matmul %0, %1, %cst {dimension_numbers = #tpu.dot_dimension_numbers<[1], [0], [0], [1], [0, 0, 1, 1], [], []>} : vector<8x16xbf16>, vector<16x128xbf16>, vector<8x128xf32> -> vector<8x128xf32>
    %c0_3 = arith.constant 0 : index
    %c0_4 = arith.constant 0 : index
    %3 = vector.load %arg4[%c0_3, %c0_4] : memref<1x128xf32, #tpu.memory_space<vmem>>, vector<1x128xf32>
    %4 = vector.broadcast %3 : vector<1x128xf32> to vector<8x128xf32>
    %5 = arith.addf %2, %4 : vector<8x128xf32>
    %cst_5 = arith.constant 3.000000e+00 : f32
    %6 = vector.broadcast %cst_5 : f32 to vector<8x128xf32>
    %7 = arith.addf %5, %6 : vector<8x128xf32>
    %cst_6 = arith.constant 0.000000e+00 : f32
    %cst_7 = arith.constant 6.000000e+00 : f32
    %8 = vector.broadcast %cst_6 : f32 to vector<8x128xf32>
    %9 = arith.maximumf %8, %7 : vector<8x128xf32>
    %10 = vector.broadcast %cst_7 : f32 to vector<8x128xf32>
    %11 = arith.minimumf %10, %9 : vector<8x128xf32>
    %12 = arith.mulf %5, %11 : vector<8x128xf32>
    %cst_8 = arith.constant 0.166666672 : f32
    %13 = vector.broadcast %cst_8 : f32 to vector<8x128xf32>
    %14 = arith.mulf %12, %13 : vector<8x128xf32>
    %15 = arith.truncf %14 : vector<8x128xf32> to vector<8x128xbf16>
    %c0_9 = arith.constant 0 : index
    %c0_10 = arith.constant 0 : index
    %16 = vector.load %arg5[%c0_9, %c0_10] : memref<128x64xbf16, #tpu.memory_space<vmem>>, vector<128x64xbf16>
    %cst_11 = arith.constant dense<0.000000e+00> : vector<8x64xf32>
    %17 = tpu.matmul %15, %16, %cst_11 {dimension_numbers = #tpu.dot_dimension_numbers<[1], [0], [0], [1], [0, 0, 1, 1], [], []>} : vector<8x128xbf16>, vector<128x64xbf16>, vector<8x64xf32> -> vector<8x64xf32>
    %c0_12 = arith.constant 0 : index
    %c0_13 = arith.constant 0 : index
    %18 = vector.load %arg6[%c0_12, %c0_13] : memref<1x64xf32, #tpu.memory_space<vmem>>, vector<1x64xf32>
    %19 = vector.broadcast %18 : vector<1x64xf32> to vector<8x64xf32>
    %20 = arith.addf %17, %19 : vector<8x64xf32>
    %cst_14 = arith.constant 3.000000e+00 : f32
    %21 = vector.broadcast %cst_14 : f32 to vector<8x64xf32>
    %22 = arith.addf %20, %21 : vector<8x64xf32>
    %cst_15 = arith.constant 0.000000e+00 : f32
    %cst_16 = arith.constant 6.000000e+00 : f32
    %23 = vector.broadcast %cst_15 : f32 to vector<8x64xf32>
    %24 = arith.maximumf %23, %22 : vector<8x64xf32>
    %25 = vector.broadcast %cst_16 : f32 to vector<8x64xf32>
    %26 = arith.minimumf %25, %24 : vector<8x64xf32>
    %27 = arith.mulf %20, %26 : vector<8x64xf32>
    %cst_17 = arith.constant 0.166666672 : f32
    %28 = vector.broadcast %cst_17 : f32 to vector<8x64xf32>
    %29 = arith.mulf %27, %28 : vector<8x64xf32>
    %c0_18 = arith.constant 0 : index
    %c0_19 = arith.constant 0 : index
    %30 = vector.load %arg2[%c0_18, %c0_19] : memref<8x16xbf16, #tpu.memory_space<vmem>>, vector<8x16xbf16>
    %c0_20 = arith.constant 0 : index
    %c0_21 = arith.constant 0 : index
    %31 = vector.load %arg3[%c0_20, %c0_21] : memref<16x128xbf16, #tpu.memory_space<vmem>>, vector<16x128xbf16>
    %cst_22 = arith.constant dense<0.000000e+00> : vector<8x128xf32>
    %32 = tpu.matmul %30, %31, %cst_22 {dimension_numbers = #tpu.dot_dimension_numbers<[1], [0], [0], [1], [0, 0, 1, 1], [], []>} : vector<8x16xbf16>, vector<16x128xbf16>, vector<8x128xf32> -> vector<8x128xf32>
    %c0_23 = arith.constant 0 : index
    %c0_24 = arith.constant 0 : index
    %33 = vector.load %arg4[%c0_23, %c0_24] : memref<1x128xf32, #tpu.memory_space<vmem>>, vector<1x128xf32>
    %34 = vector.broadcast %33 : vector<1x128xf32> to vector<8x128xf32>
    %35 = arith.addf %32, %34 : vector<8x128xf32>
    %cst_25 = arith.constant 3.000000e+00 : f32
    %36 = vector.broadcast %cst_25 : f32 to vector<8x128xf32>
    %37 = arith.addf %35, %36 : vector<8x128xf32>
    %cst_26 = arith.constant 0.000000e+00 : f32
    %cst_27 = arith.constant 6.000000e+00 : f32
    %38 = vector.broadcast %cst_26 : f32 to vector<8x128xf32>
    %39 = arith.maximumf %38, %37 : vector<8x128xf32>
    %40 = vector.broadcast %cst_27 : f32 to vector<8x128xf32>
    %41 = arith.minimumf %40, %39 : vector<8x128xf32>
    %42 = arith.mulf %35, %41 : vector<8x128xf32>
    %cst_28 = arith.constant 0.166666672 : f32
    %43 = vector.broadcast %cst_28 : f32 to vector<8x128xf32>
    %44 = arith.mulf %42, %43 : vector<8x128xf32>
    %45 = arith.truncf %44 : vector<8x128xf32> to vector<8x128xbf16>
    %c0_29 = arith.constant 0 : index
    %c0_30 = arith.constant 0 : index
    %46 = vector.load %arg5[%c0_29, %c0_30] : memref<128x64xbf16, #tpu.memory_space<vmem>>, vector<128x64xbf16>
    %cst_31 = arith.constant dense<0.000000e+00> : vector<8x64xf32>
    %47 = tpu.matmul %45, %46, %cst_31 {dimension_numbers = #tpu.dot_dimension_numbers<[1], [0], [0], [1], [0, 0, 1, 1], [], []>} : vector<8x128xbf16>, vector<128x64xbf16>, vector<8x64xf32> -> vector<8x64xf32>
    %c0_32 = arith.constant 0 : index
    %c0_33 = arith.constant 0 : index
    %48 = vector.load %arg6[%c0_32, %c0_33] : memref<1x64xf32, #tpu.memory_space<vmem>>, vector<1x64xf32>
    %49 = vector.broadcast %48 : vector<1x64xf32> to vector<8x64xf32>
    %50 = arith.addf %47, %49 : vector<8x64xf32>
    %cst_34 = arith.constant 3.000000e+00 : f32
    %51 = vector.broadcast %cst_34 : f32 to vector<8x64xf32>
    %52 = arith.addf %50, %51 : vector<8x64xf32>
    %cst_35 = arith.constant 0.000000e+00 : f32
    %cst_36 = arith.constant 6.000000e+00 : f32
    %53 = vector.broadcast %cst_35 : f32 to vector<8x64xf32>
    %54 = arith.maximumf %53, %52 : vector<8x64xf32>
    %55 = vector.broadcast %cst_36 : f32 to vector<8x64xf32>
    %56 = arith.minimumf %55, %54 : vector<8x64xf32>
    %57 = arith.mulf %50, %56 : vector<8x64xf32>
    %cst_37 = arith.constant 0.166666672 : f32
    %58 = vector.broadcast %cst_37 : f32 to vector<8x64xf32>
    %59 = arith.mulf %57, %58 : vector<8x64xf32>
    %c0_38 = arith.constant 0 : index
    %c0_39 = arith.constant 0 : index
    %60 = vector.load %arg9[%c0_38, %c0_39] : memref<64x32xf32, #tpu.memory_space<vmem>>, vector<64x32xf32>
    %cst_40 = arith.constant dense<0.000000e+00> : vector<8x32xf32>
    %61 = tpu.matmul %29, %60, %cst_40 {dimension_numbers = #tpu.dot_dimension_numbers<[1], [0], [0], [1], [0, 0, 1, 1], [], []>} : vector<8x64xf32>, vector<64x32xf32>, vector<8x32xf32> -> vector<8x32xf32>
    %c0_41 = arith.constant 0 : index
    %c0_42 = arith.constant 0 : index
    %62 = vector.load %arg10[%c0_41, %c0_42] : memref<1x32xf32, #tpu.memory_space<vmem>>, vector<1x32xf32>
    %63 = vector.broadcast %62 : vector<1x32xf32> to vector<8x32xf32>
    %64 = arith.addf %61, %63 : vector<8x32xf32>
    %65 = arith.truncf %59 : vector<8x64xf32> to vector<8x64xbf16>
    %c0_43 = arith.constant 0 : index
    %c0_44 = arith.constant 0 : index
    %66 = vector.load %arg7[%c0_43, %c0_44] : memref<64x32xbf16, #tpu.memory_space<vmem>>, vector<64x32xbf16>
    %cst_45 = arith.constant dense<0.000000e+00> : vector<8x32xf32>
    %67 = tpu.matmul %65, %66, %cst_45 {dimension_numbers = #tpu.dot_dimension_numbers<[1], [0], [0], [1], [0, 0, 1, 1], [], []>} : vector<8x64xbf16>, vector<64x32xbf16>, vector<8x32xf32> -> vector<8x32xf32>
    %c0_46 = arith.constant 0 : index
    %c0_47 = arith.constant 0 : index
    %68 = vector.load %arg8[%c0_46, %c0_47] : memref<1x32xf32, #tpu.memory_space<vmem>>, vector<1x32xf32>
    %69 = vector.broadcast %68 : vector<1x32xf32> to vector<8x32xf32>
    %70 = arith.addf %67, %69 : vector<8x32xf32>
    %71 = arith.mulf %64, %70 : vector<8x32xf32>
    %cst_48 = arith.constant dense<0.000000e+00> : vector<8xf32>
    %72 = vector.multi_reduction <add>, %71, %cst_48 [1] : vector<8x32xf32> to vector<8xf32>
    %73 = vector.shape_cast %72 : vector<8xf32> to vector<1x8xf32>
    %c0_49 = arith.constant 0 : index
    %c0_50 = arith.constant 0 : index
    %74 = vector.load %arg11[%c0_49, %c0_50] : memref<1x8xf32, #tpu.memory_space<vmem>>, vector<1x8xf32>
    tpu.vector_store %arg11[%c0_49, %c0_50], %73 {strides = array<i32>} : memref<1x8xf32, #tpu.memory_space<vmem>>, vector<1x8xf32>,
    return
  }
  func.func @transform_0(%arg0: i32) -> (i32, i32) {
    %c0_i32 = arith.constant 0 : i32
    %c0_i32_0 = arith.constant 0 : i32
    return %arg0, %c0_i32 : i32, i32
  }
  func.func @transform_1(%arg0: i32) -> (i32, i32) {
    %c0_i32 = arith.constant 0 : i32
    %c0_i32_0 = arith.constant 0 : i32
    return %arg0, %c0_i32 : i32, i32
  }
  func.func @transform_2(%arg0: i32) -> (i32, i32) {
    %c0_i32 = arith.constant 0 : i32
    %c0_i32_0 = arith.constant 0 : i32
    %c0_i32_1 = arith.constant 0 : i32
    return %c0_i32, %c0_i32_0 : i32, i32
  }
  func.func @transform_3(%arg0: i32) -> (i32, i32) {
    %c0_i32 = arith.constant 0 : i32
    %c0_i32_0 = arith.constant 0 : i32
    %c0_i32_1 = arith.constant 0 : i32
    return %c0_i32, %c0_i32_0 : i32, i32
  }
  func.func @transform_4(%arg0: i32) -> (i32, i32) {
    %c0_i32 = arith.constant 0 : i32
    %c0_i32_0 = arith.constant 0 : i32
    %c0_i32_1 = arith.constant 0 : i32
    return %c0_i32, %c0_i32_0 : i32, i32
  }
  func.func @transform_5(%arg0: i32) -> (i32, i32) {
    %c0_i32 = arith.constant 0 : i32
    %c0_i32_0 = arith.constant 0 : i32
    %c0_i32_1 = arith.constant 0 : i32
    return %c0_i32, %c0_i32_0 : i32, i32
  }
  func.func @transform_6(%arg0: i32) -> (i32, i32) {
    %c0_i32 = arith.constant 0 : i32
    %c0_i32_0 = arith.constant 0 : i32
    %c0_i32_1 = arith.constant 0 : i32
    return %c0_i32, %c0_i32_0 : i32, i32
  }
  func.func @transform_7(%arg0: i32) -> (i32, i32) {
    %c0_i32 = arith.constant 0 : i32
    %c0_i32_0 = arith.constant 0 : i32
    %c0_i32_1 = arith.constant 0 : i32
    return %c0_i32, %c0_i32_0 : i32, i32
  }
  func.func @transform_8(%arg0: i32) -> (i32, i32) {
    %c0_i32 = arith.constant 0 : i32
    %c0_i32_0 = arith.constant 0 : i32
    %c0_i32_1 = arith.constant 0 : i32
    return %c0_i32, %c0_i32_0 : i32, i32
  }
  func.func @transform_9(%arg0: i32) -> (i32, i32) {
    %c0_i32 = arith.constant 0 : i32
    %c0_i32_0 = arith.constant 0 : i32
    %c0_i32_1 = arith.constant 0 : i32
    return %c0_i32, %c0_i32_0 : i32, i32
  }
  func.func @transform_10(%arg0: i32) -> (i32, i32) {
    %c0_i32 = arith.constant 0 : i32
    %c0_i32_0 = arith.constant 0 : i32
    return %c0_i32, %arg0 : i32, i32
  }
}

</mosaic_0001>

<bundles_post_ra>
// kernel: tpu_custom_call.1
= control target key start
LH: loop header
LB: loop body
LE: loop exit
PB: predicated region body
PF: predicated region fallthrough
CT: control target
= control target key end

     0   :  { %v693_v1 = vmov 0.0   ;;  %vm53_vm0 = vcmask 130048   ;;  %vm694_vm1 = vmmov 0   ;;  %s877_s0 = inlined_call_operand.vmem [shape: bf16[8,16], index: 0, kind: input, shape index: {}]   ;;  %s878_s1 = inlined_call_operand.vmem [shape: bf16[8,16], index: 1, kind: input, shape index: {}]   ;;  %s879_s2 = inlined_call_operand.vmem [shape: bf16[16,128], index: 2, kind: input, shape index: {}]   ;;  %s880_s3 = inlined_call_operand.vmem [shape: f32[1,128], index: 3, kind: input, shape index: {}]   ;;  %s881_s4 = inlined_call_operand.vmem [shape: bf16[128,64], index: 4, kind: input, shape index: {}]   ;;  %s882_s5 = inlined_call_operand.vmem [shape: f32[1,64], index: 5, kind: input, shape index: {}]   ;;  %s883_s6 = inlined_call_operand.vmem [shape: bf16[64,32], index: 6, kind: input, shape index: {}]   ;;  %s884_s7 = inlined_call_operand.vmem [shape: f32[1,32], index: 7, kind: input, shape index: {}]   ;;  %s885_s8 = inlined_call_operand.vmem [shape: f32[64,32], index: 8, kind: input, shape index: {}]   ;;  %s886_s9 = inlined_call_operand.vmem [shape: f32[1,32], index: 9, kind: input, shape index: {}]   ;;  %s887_s10 = inlined_call_operand.hbm [shape: f32[1,8], index: 10, kind: output, shape index: {}]  }
   0x1   :  { %v658_v0 = vld [vmem:[%s879_s2] sm:$0xff]   ;;  %572 = vmatprep.subr.bf16.mxu1 %v693_v1  ;;  %598 = vmatprep.subr.bf16.mxu0 %v693_v1  ;;  %v659_v4 = vld [vmem:[%s881_s4 + $0x38] sm:$0xff]   ;;  %v660_v5 = vld [vmem:[%s881_s4 + $0x30] sm:$0xff]  }
   0x2   :  { %v37_v2 = vld [vmem:[%s877_s0] sm:$0xf]  ;;  %573 = vmatpush3.bf16.msra.mxu1 %v658_v0  ;;  %599 = vmatpush3.bf16.msra.mxu0 %v658_v0  ;;  %v661_v6 = vld [vmem:[%s881_s4 + $0x28] sm:$0xff]  }
   0x3   :  { %v219_v3 = vld [vmem:[%s878_s1] sm:$0xf]  ;;  %574 = vmatprep.mubr.msk.bf16.mxu1 %vm694_vm1, %v693_v1  ;;  %600 = vmatprep.mubr.msk.bf16.mxu0 %vm694_vm1, %v693_v1 }
   0x4   :  { %578 = vmatprep.subr.bf16.mxu1 %v693_v1  ;;  %604 = vmatprep.subr.bf16.mxu0 %v693_v1 }
   0x5   :  { %575 = vmatmul.mubr.msk.bf16.vlgmr.msra.gmra.mxu1 %vm53_vm0, %v37_v2  ;;  %601 = vmatmul.mubr.msk.bf16.vlgmr.msra.gmra.mxu0 %vm53_vm0, %v219_v3 }
   0x6   :  { %579 = vmatpush3.bf16.msra.mxu1 %v659_v4  ;;  %605 = vmatpush3.bf16.msra.mxu0 %v659_v4 }
   0x7   :  { %580 = vmatprep.subr.bf16.mxu1 %v693_v1  ;;  %606 = vmatprep.subr.bf16.mxu0 %v693_v1 }
   0x8   :  { %594 = vmatprep.mubr.msk.bf16.mxu1 %vm694_vm1, %v693_v1  ;;  %620 = vmatprep.mubr.msk.bf16.mxu0 %vm694_vm1, %v693_v1 }
   0xa   :  { %581 = vmatpush3.bf16.msra.mxu1 %v660_v5  ;;  %607 = vmatpush3.bf16.msra.mxu0 %v660_v5 }
   0xb   :  { %582 = vmatprep.subr.bf16.mxu1 %v693_v1  ;;  %608 = vmatprep.subr.bf16.mxu0 %v693_v1 }
   0xc   :  { %15 = vsyncpa [#allocation3], 0  ;;  %v662_v7 = vld [vmem:[%s881_s4 + $0x20] sm:$0xff]   ;;  %v663_v8 = vld [vmem:[%s881_s4 + $0x18] sm:$0xff]   ;;  %vm329_vm2 = vcmask 523264   ;;  %vm487_vm3 = vcmask 261120  }
   0xd   :  { %v664_v9 = vld [vmem:[%s881_s4 + $0x10] sm:$0xff]   ;;  %v665_v10 = vld [vmem:[%s881_s4 + $0x8] sm:$0xff]   ;;  %v666_v11 = vld [vmem:[%s881_s4] sm:$0xff]   ;;  %vm499_vm4 = vcmask 57344  }
   0xe   :  { %583 = vmatpush3.bf16.msra.mxu1 %v661_v6  ;;  %609 = vmatpush3.bf16.msra.mxu0 %v661_v6  ;;  %v515_v12 = vld [vmem:[%s880_s3] ss:$0 sm:$0xff]  ;;  %v321_v35 = vld [vmem:[%s885_s8 + $0x38] sm:$0xff]  ;;  %v320_v37 = vld [vmem:[%s885_s8 + $0x30] sm:$0xff] }
   0xf   :  { %584 = vmatprep.subr.bf16.mxu1 %v693_v1  ;;  %610 = vmatprep.subr.bf16.mxu0 %v693_v1  ;;  %v667_v36 = vld [vmem:[%s883_s6 + $0x18] sm:$0xff]   ;;  %v319_v38 = vld [vmem:[%s885_s8 + $0x28] sm:$0xff]  ;;  %v668_v39 = vld [vmem:[%s883_s6 + $0x10] sm:$0xff]  }
  0x10   :  { %v318_v40 = vld [vmem:[%s885_s8 + $0x20] sm:$0xff]  ;;  %v317_v41 = vld [vmem:[%s885_s8 + $0x18] sm:$0xff]  ;;  %v669_v42 = vld [vmem:[%s883_s6 + $0x8] sm:$0xff]  }
  0x11   :  { %v316_v43 = vld [vmem:[%s885_s8 + $0x10] sm:$0xff]  ;;  %v315_v44 = vld [vmem:[%s885_s8 + $0x8] sm:$0xff]  ;;  %v670_v45 = vld [vmem:[%s883_s6] sm:$0xff]  }
  0x12   :  { %585 = vmatpush3.bf16.msra.mxu1 %v662_v7  ;;  %611 = vmatpush3.bf16.msra.mxu0 %v662_v7  ;;  %v314_v46 = vld [vmem:[%s885_s8] sm:$0xff] }
  0x13   :  { %586 = vmatprep.subr.bf16.mxu1 %v693_v1  ;;  %612 = vmatprep.subr.bf16.mxu0 %v693_v1  ;;  %v518_v47 = vld [vmem:[%s882_s5] ss:$0 sm:$0xff] }
  0x14   :  { %v528_v5 = vld [vmem:[%s886_s9] ss:$0 sm:$0xff]  ;;  %s695_s9 = smov [#allocation2]  }
  0x15   :  { %v530_v7 = vld [vmem:[%s884_s7] ss:$0 sm:$0xff]  ;;  %s507_s14 = sshll.u32 %s695_s9, 4  ;;  %s508_s14 = int_to_ptr.vmem [resolvable:$true] %s507_s14 }
  0x16   :  { %587 = vmatpush3.bf16.msra.mxu1 %v663_v8  ;;  %613 = vmatpush3.bf16.msra.mxu0 %v663_v8  ;;  %s671_s7 = scalar_lea.vmem %s508_s14, 16  ;;  %s675_s15 = scalar_lea.vmem %s508_s14, 32 }
  0x17   :  { %588 = vmatprep.subr.bf16.mxu1 %v693_v1  ;;  %614 = vmatprep.subr.bf16.mxu0 %v693_v1  ;;  %p672_p0 = scmp.ne.s32.totalorder %s508_s14, %s671_s7  ;;  %p676_p1 = scmp.lt.s32.totalorder %s508_s14, %s508_s14 }
  0x18   :  { %p677_p2 = scmp.lt.s32.totalorder %s675_s15, %s671_s7 }
  0x1a   :  { %589 = vmatpush3.bf16.msra.mxu1 %v664_v9  ;;  %615 = vmatpush3.bf16.msra.mxu0 %v664_v9  ;;  %p678_p3 = por %p677_p2, %p676_p1 }
  0x1b   :  { %590 = vmatprep.subr.bf16.mxu1 %v693_v1  ;;  %616 = vmatprep.subr.bf16.mxu0 %v693_v1 }
  0x1c   :  { %p679_p4 = pnand %p678_p3, %p672_p0 }
  0x1e   :  { %591 = vmatpush3.bf16.msra.mxu1 %v665_v10  ;;  %617 = vmatpush3.bf16.msra.mxu0 %v665_v10 }
  0x1f   :  { %592 = vmatprep.subr.bf16.mxu1 %v693_v1  ;;  %618 = vmatprep.subr.bf16.mxu0 %v693_v1 }
  0x22   :  { %593 = vmatpush3.bf16.msra.mxu1 %v666_v11  ;;  %619 = vmatpush3.bf16.msra.mxu0 %v666_v11 }
  0x23   :  { %624 = vmatprep.subr.mxu1 %v693_v1  ;;  %643 = vmatprep.subr.bf16.mxu0 %v693_v1 }
  0xc5   :  { %v91_v13 = vpop.f32.mrf.mxu1  ;;  %v257_v14 = vpop.f32.mrf.mxu0 }
  0xc6   :  { %v92_v15 = vadd.f32 %v515_v12, %v91_v13  ;;  %v258_v16 = vadd.f32 %v515_v12, %v257_v14 }
  0xc7   :  { %v576_v17 = vpop.f32.mrf.mxu1  ;;  %v602_v18 = vpop.f32.mrf.mxu0 }
  0xc8   :  { %v97_v19 = vadd.f32 3.0, %v92_v15  ;;  %v263_v20 = vadd.f32 3.0, %v258_v16  ;;  %v492_v17 = vlaneseq }
  0xc9   :  { %v94_v21 = vpop.f32.mrf.mxu1  ;;  %v260_v22 = vpop.f32.mrf.mxu0 }
  0xca   :  { %v98_v23 = vmax.f32 %v97_v19, 0.0  ;;  %v264_v24 = vmax.f32 %v263_v20, 0.0  ;;  %v493_v18 = vand.u32 127, %v492_v17  ;;  %v495_v19 = vshrl.u32 %v492_v17, 7 }
  0xcb   :  { %v577_v25 = vpop.f32.mrf.mxu1  ;;  %v603_v26 = vpop.f32.mrf.mxu0 }
  0xcc   :  { %v99_v27 = vmin.f32 %v98_v23, 6.0  ;;  %v265_v28 = vmin.f32 %v264_v24, 6.0  ;;  %v496_v20 = vsub.s32 %v493_v18, %v495_v19 }
  0xce   :  { %v100_v29 = vmul.f32 %v99_v27, %v92_v15  ;;  %v266_v30 = vmul.f32 %v265_v28, %v258_v16 }
  0xd0   :  { %v101_v31 = vmul.f32 0.16666667, %v100_v29  ;;  %v267_v32 = vmul.f32 0.16666667, %v266_v30 }
  0xd2   :  { %v102_v33 = vpack.c.bf16 %v101_v31, %v101_v31  ;;  %v268_v34 = vpack.c.bf16 %v267_v32, %v267_v32 }
  0xd4   :  { %595 = vmatmul.mubr.bf16.vlgmr.msra.gmra.mxu1 %v102_v33  ;;  %621 = vmatmul.mubr.bf16.vlgmr.msra.gmra.mxu0 %v268_v34 }
  0xd5   :  { %625 = vmatpush3.msra.mxu1 %v321_v35  ;;  %640 = vmatprep.mubr.msk.f32.mxu1 %vm694_vm1, %v693_v1 }
  0xd6   :  { %626 = vmatprep.subr.mxu1 %v693_v1  ;;  %651 = vmatprep.mubr.msk.bf16.mxu0 %vm694_vm1, %v693_v1 }
  0xd7   :  { %627 = vmatpush3.msra.mxu1 %v320_v37  ;;  %644 = vmatpush3.bf16.msra.mxu0 %v667_v36 }
  0xd8   :  { %628 = vmatprep.subr.mxu1 %v693_v1  ;;  %645 = vmatprep.subr.bf16.mxu0 %v693_v1 }
  0xd9   :  { %629 = vmatpush3.msra.mxu1 %v319_v38 }
  0xda   :  { %630 = vmatprep.subr.mxu1 %v693_v1 }
  0xdb   :  { %631 = vmatpush3.msra.mxu1 %v318_v40  ;;  %646 = vmatpush3.bf16.msra.mxu0 %v668_v39 }
  0xdc   :  { %632 = vmatprep.subr.mxu1 %v693_v1  ;;  %647 = vmatprep.subr.bf16.mxu0 %v693_v1 }
  0xdd   :  { %633 = vmatpush3.msra.mxu1 %v317_v41 }
  0xde   :  { %634 = vmatprep.subr.mxu1 %v693_v1 }
  0xdf   :  { %635 = vmatpush3.msra.mxu1 %v316_v43  ;;  %648 = vmatpush3.bf16.msra.mxu0 %v669_v42 }
  0xe0   :  { %636 = vmatprep.subr.mxu1 %v693_v1  ;;  %649 = vmatprep.subr.bf16.mxu0 %v693_v1 }
  0xe1   :  { %637 = vmatpush3.msra.mxu1 %v315_v44 }
  0xe2   :  { %638 = vmatprep.subr.mxu1 %v693_v1 }
  0xe3   :  { %639 = vmatpush3.msra.mxu1 %v314_v46  ;;  %650 = vmatpush3.bf16.msra.mxu0 %v670_v45 }
 0x194   :  { %v208_v48 = vpop.f32.mrf.mxu1  ;;  %v303_v49 = vpop.f32.mrf.mxu0 }
 0x195   :  { %v209_v50 = vadd.f32 %v518_v47, %v208_v48  ;;  %v304_v51 = vadd.f32 %v518_v47, %v303_v49 }
 0x196   :  { %v596_v52 = vpop.f32.mrf.mxu1  ;;  %v622_v53 = vpop.f32.mrf.mxu0 }
 0x197   :  { %v214_v54 = vadd.f32 3.0, %v209_v50  ;;  %v309_v55 = vadd.f32 3.0, %v304_v51 }
 0x198   :  { %v211_v56 = vpop.f32.mrf.mxu1  ;;  %v306_v57 = vpop.f32.mrf.mxu0 }
 0x199   :  { %v215_v58 = vmax.f32 %v214_v54, 0.0  ;;  %v310_v59 = vmax.f32 %v309_v55, 0.0 }
 0x19a   :  { %v597_v60 = vpop.f32.mrf.mxu1  ;;  %v623_v61 = vpop.f32.mrf.mxu0 }
 0x19b   :  { %v216_v62 = vmin.f32 %v215_v58, 6.0  ;;  %v311_v63 = vmin.f32 %v310_v59, 6.0 }
 0x19d   :  { %v217_v0 = vmul.f32 %v216_v62, %v209_v50  ;;  %v312_v1 = vmul.f32 %v311_v63, %v304_v51 }
 0x19f   :  { %v218_v2 = vmul.f32 0.16666667, %v217_v0  ;;  %v313_v3 = vmul.f32 0.16666667, %v312_v1 }
 0x1a1   :  { %v403_v4 = vpack.c.bf16 %v313_v3, %v313_v3  ;;  %641 = vmatmul.mubr.msk.f32.vlgmr.msra.gmra.mxu1 %vm329_vm2, %v218_v2 }
 0x1a3   :  { %652 = vmatmul.mubr.msk.bf16.vlgmr.msra.gmra.mxu0 %vm329_vm2, %v403_v4 }
 0x261   :  { %v399_v6 = vpop.f32.mrf.mxu1 }
 0x262   :  { %v400_v10 = vadd.f32 %v528_v5, %v399_v6 }
 0x263   :  { %v642_v8 = vpop.f32.mrf.mxu1  ;;  %v480_v9 = vpop.f32.mrf.mxu0 }
 0x264   :  { %v481_v11 = vadd.f32 %v530_v7, %v480_v9 }
 0x265   :  { %v653_v12 = vpop.f32.mrf.mxu0 }
 0x266   :  { %v486_v13 = vmul.f32 %v481_v11, %v400_v10 }
 0x267   :  { %v483_v14 = vpop.f32.mrf.mxu0 }
 0x268   :  { %v488_v15 = vsel %vm487_vm3, %v486_v13, 0.0 }
 0x269   :  { %v654_v16 = vpop.f32.mrf.mxu0  ;;  %489 = vadd.xlane.f32.xlu0 %v488_v15 }
 0x2f2   :  { %v490_v21 = vpop.xlane.xlu0 %489 }
 0x2f3   :  { %v497_v22 = vrot.slane %v490_v21, %v496_v20 }
 0x2f5   :  { %500 = vst.msk [vmem:[#allocation2] sm:$0x1] %vm499_vm4, %v497_v22 }
 0x2f6   :  { %682 = shalt.err (!%p679_p4)
}
 0x2f7   :  { %510 = dma.vmem_to_hbm [thread:$0]  %s508_s14, 16, %s887_s10, [#allocation3]  }
 0x2f8   :  { %691 = dma.done.wait [#allocation3], 16  }
 0x2f9   :  { %692 = vsyncadd [#allocation3], 4294967280 }
 0x2fa   :  { %514 = vsyncpa [#allocation3], 1 }

</bundles_post_ra>
